<compile_context>
chip_gen: v7x
topology: tpu7x:2x2x1
jax: 0.10.0
libtpu: 0.0.40
codegen_flags: <defaults>
</compile_context>

<pallas_src>
import functools
import math

import jax
import jax.numpy as jnp
from jax import lax
from jax.experimental import pallas as pl
from jax.experimental.pallas import tpu as pltpu


# ---------------------------------------------------------------------------
# Kernel bodies
# ---------------------------------------------------------------------------
def _attention_core(num_heads, head_dim, tb, seq_len, cdt, q, k, v):
    """Scaled-dot-product attention over a (tb*S, D) row slab.

    q, k, v : (tb*S, D) float32 projections (q already carries the
              1/sqrt(head_dim) scale, folded into the query weights).
    Returns the concatenated per-head context, (tb*S, D), in `cdt`.
    """
    d_model = num_heads * head_dim
    # (tm, D) -> (tb, S, D): sublane-only reshape (lane dim untouched), free.
    q = q.astype(cdt).reshape(tb, seq_len, d_model)
    k = k.astype(cdt).reshape(tb, seq_len, d_model)
    v = v.astype(cdt).reshape(tb, seq_len, d_model)

    # Batched-over-tb dot_generals: H MXU ops per grid step instead of tb*H
    # tiny ones; contracting the last dims of q and k avoids an explicit
    # transpose (no XLU pass per head).
    ctx_heads = []
    for h in range(num_heads):                       # static, small
        c0 = h * head_dim
        qh = q[:, :, c0:c0 + head_dim]               # (tb, S, hd)
        kh = k[:, :, c0:c0 + head_dim]
        vh = v[:, :, c0:c0 + head_dim]

        logits = lax.dot_general(qh, kh, (((2,), (2,)), ((0,), (0,))),
                                 preferred_element_type=jnp.float32)  # (tb,S,S)
        logits = logits - jnp.max(logits, axis=-1, keepdims=True)
        p = jnp.exp(logits)
        p = p * pl.reciprocal(jnp.sum(p, axis=-1, keepdims=True), approx=True)

        ctx_heads.append(
            lax.dot_general(p.astype(cdt), vh, (((2,), (1,)), ((0,), (0,))),
                            preferred_element_type=jnp.float32))      # (tb,S,hd)

    # Concatenate heads in-register -> one lane-dense (tm, D) slab; no
    # head_dim-wide masked vst.msk column stores.
    ctx = jnp.concatenate(ctx_heads, axis=-1)        # (tb, S, D) f32
    return ctx.reshape(tb * seq_len, d_model).astype(cdt)


def _mha_cross_kernel(num_heads, head_dim, tb, seq_len,
                      xq_ref, xk_ref, xv_ref,
                      w_in_ref, wo_ref, b_in_ref, bo_ref,
                      o_ref):
    """General (distinct Q, K, V) path. One grid step == `tb` batch elements.

    xq/xk/xv_ref : (tb*S, D) tiles in compute dtype
    w_in_ref     : (3, D, D) stacked, pre-transposed  Wq*scale | Wk | Wv
    wo_ref       : (D, D)    pre-transposed out-projection weight
    b_in_ref     : (3, D)    f32 rows: bq*scale, bk, bv
    bo_ref       : (1, D)    f32 out-projection bias
    o_ref        : (tb*S, D)
    """
    cdt = xq_ref.dtype
    # Input projections: large (tm, D) x (D, D) MXU matmuls, f32 accumulation.
    q = jnp.dot(xq_ref[...], w_in_ref[0], preferred_element_type=jnp.float32) + b_in_ref[0]
    k = jnp.dot(xk_ref[...], w_in_ref[1], preferred_element_type=jnp.float32) + b_in_ref[1]
    v = jnp.dot(xv_ref[...], w_in_ref[2], preferred_element_type=jnp.float32) + b_in_ref[2]

    ctx = _attention_core(num_heads, head_dim, tb, seq_len, cdt, q, k, v)

    # Output projection: one (tm, D) x (D, D) matmul, lane-dense (tm, D) store.
    y = jnp.dot(ctx, wo_ref[...], preferred_element_type=jnp.float32) + bo_ref[0]
    o_ref[...] = y.astype(o_ref.dtype)


def _mha_self_kernel(num_heads, head_dim, tb, seq_len,
                     x_ref, w_qkv_ref, wo_ref, b_qkv_ref, bo_ref,
                     o_ref):
    """Fused self-attention path (Q is K is V, the PatchTST case): one input
    stream, one (tm, D) x (D, 3D) projection -> ~3x less input HBM traffic and
    a 3x wider MXU N dimension."""
    cdt = x_ref.dtype
    d_model = num_heads * head_dim
    qkv = jnp.dot(x_ref[...], w_qkv_ref[...],
                  preferred_element_type=jnp.float32) + b_qkv_ref[0]   # (tm, 3D)
    q = qkv[:, 0 * d_model:1 * d_model]
    k = qkv[:, 1 * d_model:2 * d_model]
    v = qkv[:, 2 * d_model:3 * d_model]

    ctx = _attention_core(num_heads, head_dim, tb, seq_len, cdt, q, k, v)

    y = jnp.dot(ctx, wo_ref[...], preferred_element_type=jnp.float32) + bo_ref[0]
    o_ref[...] = y.astype(o_ref.dtype)


# ---------------------------------------------------------------------------
# Parameter prep (one-time, hoisted out of the per-forward path)
# ---------------------------------------------------------------------------
def prepare_params(params, num_heads, compute_dtype=jnp.bfloat16):
    """Transpose weights so the kernel does plain x @ w == x @ W^T, fold the
    1/sqrt(head_dim) softmax scale into the query projection, and build the
    fused (D, 3D) QKV weight for the self-attention path."""
    in_w = jnp.asarray(params["in_proj_weight"])      # (3D, D)
    in_b = jnp.asarray(params["in_proj_bias"])        # (3D,)
    out_w = jnp.asarray(params["out_proj_weight"])    # (D, D)
    out_b = jnp.asarray(params["out_proj_bias"])      # (D,)
    d_model = out_w.shape[0]
    assert d_model % num_heads == 0
    head_dim = d_model // num_heads
    scale = 1.0 / math.sqrt(head_dim)

    wq = in_w[0 * d_model:1 * d_model] * scale        # fold softmax scale
    wk = in_w[1 * d_model:2 * d_model]
    wv = in_w[2 * d_model:3 * d_model]
    bq = in_b[0 * d_model:1 * d_model] * scale
    bk = in_b[1 * d_model:2 * d_model]
    bv = in_b[2 * d_model:3 * d_model]

    return {
        "num_heads": num_heads,
        "head_dim": head_dim,
        "d_model": d_model,
        "compute_dtype": compute_dtype,
        "w_in": jnp.stack([wq.T, wk.T, wv.T]).astype(compute_dtype),           # (3, D, D)
        "w_qkv": jnp.concatenate([wq.T, wk.T, wv.T], axis=1).astype(compute_dtype),  # (D, 3D)
        "w_o": out_w.T.astype(compute_dtype),                                   # (D, D)
        "b_in": jnp.stack([bq, bk, bv]).astype(jnp.float32),                    # (3, D)
        "b_qkv": jnp.concatenate([bq, bk, bv]).reshape(1, 3 * d_model).astype(jnp.float32),
        "b_o": out_b.reshape(1, d_model).astype(jnp.float32),
    }


# ---------------------------------------------------------------------------
# Tiling / VMEM heuristics
# ---------------------------------------------------------------------------
def _pick_batch_tile(B, S, max_rows=512):
    """Largest batch tile `tb` dividing B such that tb*S is a legal block row
    count (multiple of 8 sublanes, or the full extent) within `max_rows`
    (sized for v7x's 64 MiB VMEM). Prefers an even number of grid steps so
    both v7x TensorCores get work under dimension_semantics=("parallel",)."""
    cands = [tb for tb in range(1, B + 1)
             if B % tb == 0 and ((tb * S) % 8 == 0 or tb == B) and tb * S <= max_rows]
    if not cands:
        cands = [B]                       # full-extent block is always legal
    even = [tb for tb in cands if (B // tb) % 2 == 0]
    pool = even if even else cands
    return max(pool)


def _vmem_limit_bytes(tm, seq_len, d_model, compute_dtype, out_dtype):
    """Rough upper bound on scoped-VMEM footprint: double-buffered Q/K/V and
    output blocks, double-buffered weight/bias blocks, and in-kernel f32
    temporaries (projections, logits, context), with ~50% headroom; clamped
    to stay inside v7x's 64 MiB physical VMEM."""
    cb = jnp.dtype(compute_dtype).itemsize
    ob = jnp.dtype(out_dtype).itemsize
    io_blocks = 3 * 2 * tm * d_model * cb + 2 * tm * d_model * ob
    weights = 2 * (4 * d_model * d_model * cb + 5 * d_model * 4)
    temps = 6 * tm * d_model * 4 + 2 * tm * seq_len * 4
    est = io_blocks + weights + temps
    return int(min(max(1.5 * est + (2 << 20), 16 << 20), 48 << 20))


# ---------------------------------------------------------------------------
# Public wrapper
# ---------------------------------------------------------------------------
def multihead_attention(Q, K, V, prep, max_rows=512):
    """Forward of nn.MultiheadAttention(batch_first=True, dropout=0.0,
    need_weights=False). Q, K, V: (B, S, D); prep = prepare_params(...)."""
    B, S, d_model = Q.shape
    assert K.shape == Q.shape and V.shape == Q.shape
    assert d_model == prep["d_model"]
    cdt = prep["compute_dtype"]
    out_dtype = Q.dtype
    num_heads, head_dim = prep["num_heads"], prep["head_dim"]

    tb = _pick_batch_tile(B, S, max_rows=max_rows)
    tm = tb * S                           # rows per grid step (MXU M dim)
    grid = (B // tb,)

    row_spec = pl.BlockSpec((tm, d_model), lambda i: (i, 0))
    w_spec = lambda shape: pl.BlockSpec(shape, lambda i: (0,) * len(shape))

    cparams = pltpu.CompilerParams(
        dimension_semantics=("parallel",),
        vmem_limit_bytes=_vmem_limit_bytes(tm, S, d_model, cdt, out_dtype))

    self_attention = (Q is K) and (K is V)

    if self_attention:
        Xf = Q.reshape(B * S, d_model).astype(cdt)
        kernel = functools.partial(_mha_self_kernel, num_heads, head_dim, tb, S)
        out = pl.pallas_call(
            kernel,
            out_shape=jax.ShapeDtypeStruct((B * S, d_model), out_dtype),
            grid_spec=pltpu.PrefetchScalarGridSpec(
                num_scalar_prefetch=0,
                grid=grid,
                in_specs=[row_spec,
                          w_spec((d_model, 3 * d_model)),   # fused Wq|Wk|Wv
                          w_spec((d_model, d_model)),       # Wo
                          w_spec((1, 3 * d_model)),         # fused bias
                          w_spec((1, d_model))],            # bo
                out_specs=row_spec),
            compiler_params=cparams,
        )(Xf, prep["w_qkv"], prep["w_o"], prep["b_qkv"], prep["b_o"])
    else:
        Qf = Q.reshape(B * S, d_model).astype(cdt)
        Kf = K.reshape(B * S, d_model).astype(cdt)
        Vf = V.reshape(B * S, d_model).astype(cdt)
        kernel = functools.partial(_mha_cross_kernel, num_heads, head_dim, tb, S)
        out = pl.pallas_call(
            kernel,
            out_shape=jax.ShapeDtypeStruct((B * S, d_model), out_dtype),
            grid_spec=pltpu.PrefetchScalarGridSpec(
                num_scalar_prefetch=0,
                grid=grid,
                in_specs=[row_spec, row_spec, row_spec,
                          w_spec((3, d_model, d_model)),    # Wq|Wk|Wv
                          w_spec((d_model, d_model)),       # Wo
                          w_spec((3, d_model)),             # bq|bk|bv
                          w_spec((1, d_model))],            # bo
                out_specs=row_spec),
            compiler_params=cparams,
        )(Qf, Kf, Vf, prep["w_in"], prep["w_o"], prep["b_in"], prep["b_o"])

    return out.reshape(B, S, d_model)


# ---------------------------------------------------------------------------
# Pure-JAX reference & synthetic params
# ---------------------------------------------------------------------------
def _reference_mha(Q, K, V, params, num_heads):
    """Pure-JAX reference matching torch.nn.MultiheadAttention forward."""
    B, S, D = Q.shape
    hd = D // num_heads
    in_w, in_b = params["in_proj_weight"], params["in_proj_bias"]
    out_w, out_b = params["out_proj_weight"], params["out_proj_bias"]

    q = Q @ in_w[0 * D:1 * D].T + in_b[0 * D:1 * D]
    k = K @ in_w[1 * D:2 * D].T + in_b[1 * D:2 * D]
    v = V @ in_w[2 * D:3 * D].T + in_b[2 * D:3 * D]

    def split(x):  # (B, S, D) -> (B, H, S, hd)
        return x.reshape(B, S, num_heads, hd).transpose(0, 2, 1, 3)

    qh, kh, vh = split(q), split(k), split(v)
    logits = jnp.einsum("bhqd,bhkd->bhqk", qh, kh) / math.sqrt(hd)
    p = jax.nn.softmax(logits, axis=-1)
    o = jnp.einsum("bhqk,bhkd->bhqd", p, vh)
    o = o.transpose(0, 2, 1, 3).reshape(B, S, D)
    return o @ out_w.T + out_b


def init_params(key, d_model):
    """Deterministic synthetic init mirroring nn.MultiheadAttention shapes."""
    k1, k2, k3, k4 = jax.random.split(key, 4)
    bound = 1.0 / math.sqrt(d_model)
    return {
        "in_proj_weight": jax.random.uniform(
            k1, (3 * d_model, d_model), jnp.float32, -bound, bound),
        "in_proj_bias": jax.random.uniform(
            k2, (3 * d_model,), jnp.float32, -bound, bound),
        "out_proj_weight": jax.random.uniform(
            k3, (d_model, d_model), jnp.float32, -bound, bound),
        "out_proj_bias": jax.random.uniform(
            k4, (d_model,), jnp.float32, -bound, bound),
    }


if __name__ == "__main__":
    B, S, D, H = 2, 8, 32, 4   # batch, num_patches, d_model, num_heads

    key = jax.random.PRNGKey(0)
    kx, kq, kk, kv, kp = jax.random.split(key, 5)
    params = init_params(kp, D)
    prep = prepare_params(params, num_heads=H)   # one-time weight prep

    # PatchTST self-attention path (Q is K is V): fused-QKV kernel.
    X = jax.random.normal(kx, (B, S, D), jnp.float32)
    out_self = jax.block_until_ready(multihead_attention(X, X, X, prep))
    ref_self = _reference_mha(X, X, X, params, num_heads=H)

    # General path with distinct Q, K, V.
    Q = jax.random.normal(kq, (B, S, D), jnp.float32)
    K = jax.random.normal(kk, (B, S, D), jnp.float32)
    V = jax.random.normal(kv, (B, S, D), jnp.float32)
    out_cross = jax.block_until_ready(multihead_attention(Q, K, V, prep))
    ref_cross = _reference_mha(Q, K, V, params, num_heads=H)

    assert out_self.shape == (B, S, D) and out_cross.shape == (B, S, D)
    # Tolerance accommodates bfloat16 MXU operands and the EUP approximate
    # reciprocal in the softmax denominator vs. the f32 reference; real bugs
    # produce O(1) errors.
    assert jnp.allclose(out_self, ref_self, atol=5e-2, rtol=5e-2), "self-attn mismatch"
    assert jnp.allclose(out_cross, ref_cross, atol=5e-2, rtol=5e-2), "cross-attn mismatch"

    print("KERNEL_OK")
</pallas_src>

<mosaic_0001>
module attributes {stable_mosaic.version = 11 : i64} {
  func.func @_mha_self_kernel(%arg0: i32, %arg1: memref<8x32xbf16, #tpu.memory_space<vmem>>, %arg2: memref<32x96xbf16, #tpu.memory_space<vmem>>, %arg3: memref<32x32xbf16, #tpu.memory_space<vmem>>, %arg4: memref<1x96xf32, #tpu.memory_space<vmem>>, %arg5: memref<1x32xf32, #tpu.memory_space<vmem>>, %arg6: memref<8x32xf32, #tpu.memory_space<vmem>>) attributes {dimension_semantics = [#tpu.dimension_semantics<parallel>], iteration_bounds = array<i64: 2>, scalar_prefetch = 0 : i64, scratch_operands = 0 : i64, tpu.core_type = #tpu.core_type<tc>, window_params = [{transform_indices = @transform_0, window_bounds = array<i64: 8, 32>}, {pipeline_mode = #tpu.pipeline_mode<synchronous>, transform_indices = @transform_1, window_bounds = array<i64: 32, 96>}, {pipeline_mode = #tpu.pipeline_mode<synchronous>, transform_indices = @transform_2, window_bounds = array<i64: 32, 32>}, {pipeline_mode = #tpu.pipeline_mode<synchronous>, transform_indices = @transform_3, window_bounds = array<i64: 1, 96>}, {pipeline_mode = #tpu.pipeline_mode<synchronous>, transform_indices = @transform_4, window_bounds = array<i64: 1, 32>}, {transform_indices = @transform_5, window_bounds = array<i64: 8, 32>}]} {
    %c0 = arith.constant 0 : index
    %c0_0 = arith.constant 0 : index
    %0 = vector.load %arg1[%c0, %c0_0] : memref<8x32xbf16, #tpu.memory_space<vmem>>, vector<8x32xbf16>
    %c0_1 = arith.constant 0 : index
    %c0_2 = arith.constant 0 : index
    %1 = vector.load %arg2[%c0_1, %c0_2] : memref<32x96xbf16, #tpu.memory_space<vmem>>, vector<32x96xbf16>
    %cst = arith.constant dense<0.000000e+00> : vector<8x96xf32>
    %2 = tpu.matmul %0, %1, %cst {dimension_numbers = #tpu.dot_dimension_numbers<[1], [0], [0], [1], [0, 0, 1, 1], [], []>} : vector<8x32xbf16>, vector<32x96xbf16>, vector<8x96xf32> -> vector<8x96xf32>
    %c0_3 = arith.constant 0 : index
    %c0_4 = arith.constant 0 : index
    %3 = vector.load %arg4[%c0_3, %c0_4] : memref<1x96xf32, #tpu.memory_space<vmem>>, vector<1x96xf32>
    %4 = vector.shape_cast %3 : vector<1x96xf32> to vector<96xf32>
    %5 = vector.shape_cast %4 : vector<96xf32> to vector<1x96xf32>
    %6 = vector.broadcast %5 : vector<1x96xf32> to vector<8x96xf32>
    %7 = arith.addf %2, %6 : vector<8x96xf32>
    %8 = vector.extract_strided_slice %7 {offsets = [0, 0], sizes = [8, 32], strides = [1, 1]} : vector<8x96xf32> to vector<8x32xf32>
    %9 = vector.extract_strided_slice %7 {offsets = [0, 32], sizes = [8, 32], strides = [1, 1]} : vector<8x96xf32> to vector<8x32xf32>
    %10 = vector.extract_strided_slice %7 {offsets = [0, 64], sizes = [8, 32], strides = [1, 1]} : vector<8x96xf32> to vector<8x32xf32>
    %11 = arith.truncf %8 : vector<8x32xf32> to vector<8x32xbf16>
    %12 = vector.shape_cast %11 : vector<8x32xbf16> to vector<1x8x32xbf16>
    %13 = arith.truncf %9 : vector<8x32xf32> to vector<8x32xbf16>
    %14 = vector.shape_cast %13 : vector<8x32xbf16> to vector<1x8x32xbf16>
    %15 = arith.truncf %10 : vector<8x32xf32> to vector<8x32xbf16>
    %16 = vector.shape_cast %15 : vector<8x32xbf16> to vector<1x8x32xbf16>
    %17 = vector.extract_strided_slice %12 {offsets = [0, 0, 0], sizes = [1, 8, 8], strides = [1, 1, 1]} : vector<1x8x32xbf16> to vector<1x8x8xbf16>
    %18 = vector.extract_strided_slice %14 {offsets = [0, 0, 0], sizes = [1, 8, 8], strides = [1, 1, 1]} : vector<1x8x32xbf16> to vector<1x8x8xbf16>
    %19 = vector.extract_strided_slice %16 {offsets = [0, 0, 0], sizes = [1, 8, 8], strides = [1, 1, 1]} : vector<1x8x32xbf16> to vector<1x8x8xbf16>
    %cst_5 = arith.constant dense<0.000000e+00> : vector<1x8x8xf32>
    %20 = tpu.matmul %17, %18, %cst_5 {dimension_numbers = #tpu.dot_dimension_numbers<[2], [2], [1], [1], [0, 0, 0, 1, 1, 1], [0], [0]>} : vector<1x8x8xbf16>, vector<1x8x8xbf16>, vector<1x8x8xf32> -> vector<1x8x8xf32>
    %cst_6 = arith.constant dense<0xFF800000> : vector<1x8xf32>
    %21 = vector.multi_reduction <maximumf>, %20, %cst_6 [2] : vector<1x8x8xf32> to vector<1x8xf32>
    %22 = vector.shape_cast %21 : vector<1x8xf32> to vector<1x8x1xf32>
    %23 = vector.broadcast %22 : vector<1x8x1xf32> to vector<1x8x8xf32>
    %24 = arith.subf %20, %23 : vector<1x8x8xf32>
    %25 = math.exp %24 : vector<1x8x8xf32>
    %cst_7 = arith.constant dense<0.000000e+00> : vector<1x8xf32>
    %26 = vector.multi_reduction <add>, %25, %cst_7 [2] : vector<1x8x8xf32> to vector<1x8xf32>
    %27 = vector.shape_cast %26 : vector<1x8xf32> to vector<1x8x1xf32>
    %28 = tpu.reciprocal %27 {approx = true} : vector<1x8x1xf32> -> vector<1x8x1xf32>
    %29 = vector.broadcast %28 : vector<1x8x1xf32> to vector<1x8x8xf32>
    %30 = arith.mulf %25, %29 : vector<1x8x8xf32>
    %31 = arith.truncf %30 : vector<1x8x8xf32> to vector<1x8x8xbf16>
    %cst_8 = arith.constant dense<0.000000e+00> : vector<1x8x8xf32>
    %32 = tpu.matmul %31, %19, %cst_8 {dimension_numbers = #tpu.dot_dimension_numbers<[2], [1], [1], [2], [0, 0, 0, 1, 1, 2], [0], [0]>} : vector<1x8x8xbf16>, vector<1x8x8xbf16>, vector<1x8x8xf32> -> vector<1x8x8xf32>
    %33 = vector.extract_strided_slice %12 {offsets = [0, 0, 8], sizes = [1, 8, 8], strides = [1, 1, 1]} : vector<1x8x32xbf16> to vector<1x8x8xbf16>
    %34 = vector.extract_strided_slice %14 {offsets = [0, 0, 8], sizes = [1, 8, 8], strides = [1, 1, 1]} : vector<1x8x32xbf16> to vector<1x8x8xbf16>
    %35 = vector.extract_strided_slice %16 {offsets = [0, 0, 8], sizes = [1, 8, 8], strides = [1, 1, 1]} : vector<1x8x32xbf16> to vector<1x8x8xbf16>
    %cst_9 = arith.constant dense<0.000000e+00> : vector<1x8x8xf32>
    %36 = tpu.matmul %33, %34, %cst_9 {dimension_numbers = #tpu.dot_dimension_numbers<[2], [2], [1], [1], [0, 0, 0, 1, 1, 1], [0], [0]>} : vector<1x8x8xbf16>, vector<1x8x8xbf16>, vector<1x8x8xf32> -> vector<1x8x8xf32>
    %cst_10 = arith.constant dense<0xFF800000> : vector<1x8xf32>
    %37 = vector.multi_reduction <maximumf>, %36, %cst_10 [2] : vector<1x8x8xf32> to vector<1x8xf32>
    %38 = vector.shape_cast %37 : vector<1x8xf32> to vector<1x8x1xf32>
    %39 = vector.broadcast %38 : vector<1x8x1xf32> to vector<1x8x8xf32>
    %40 = arith.subf %36, %39 : vector<1x8x8xf32>
    %41 = math.exp %40 : vector<1x8x8xf32>
    %cst_11 = arith.constant dense<0.000000e+00> : vector<1x8xf32>
    %42 = vector.multi_reduction <add>, %41, %cst_11 [2] : vector<1x8x8xf32> to vector<1x8xf32>
    %43 = vector.shape_cast %42 : vector<1x8xf32> to vector<1x8x1xf32>
    %44 = tpu.reciprocal %43 {approx = true} : vector<1x8x1xf32> -> vector<1x8x1xf32>
    %45 = vector.broadcast %44 : vector<1x8x1xf32> to vector<1x8x8xf32>
    %46 = arith.mulf %41, %45 : vector<1x8x8xf32>
    %47 = arith.truncf %46 : vector<1x8x8xf32> to vector<1x8x8xbf16>
    %cst_12 = arith.constant dense<0.000000e+00> : vector<1x8x8xf32>
    %48 = tpu.matmul %47, %35, %cst_12 {dimension_numbers = #tpu.dot_dimension_numbers<[2], [1], [1], [2], [0, 0, 0, 1, 1, 2], [0], [0]>} : vector<1x8x8xbf16>, vector<1x8x8xbf16>, vector<1x8x8xf32> -> vector<1x8x8xf32>
    %49 = vector.extract_strided_slice %12 {offsets = [0, 0, 16], sizes = [1, 8, 8], strides = [1, 1, 1]} : vector<1x8x32xbf16> to vector<1x8x8xbf16>
    %50 = vector.extract_strided_slice %14 {offsets = [0, 0, 16], sizes = [1, 8, 8], strides = [1, 1, 1]} : vector<1x8x32xbf16> to vector<1x8x8xbf16>
    %51 = vector.extract_strided_slice %16 {offsets = [0, 0, 16], sizes = [1, 8, 8], strides = [1, 1, 1]} : vector<1x8x32xbf16> to vector<1x8x8xbf16>
    %cst_13 = arith.constant dense<0.000000e+00> : vector<1x8x8xf32>
    %52 = tpu.matmul %49, %50, %cst_13 {dimension_numbers = #tpu.dot_dimension_numbers<[2], [2], [1], [1], [0, 0, 0, 1, 1, 1], [0], [0]>} : vector<1x8x8xbf16>, vector<1x8x8xbf16>, vector<1x8x8xf32> -> vector<1x8x8xf32>
    %cst_14 = arith.constant dense<0xFF800000> : vector<1x8xf32>
    %53 = vector.multi_reduction <maximumf>, %52, %cst_14 [2] : vector<1x8x8xf32> to vector<1x8xf32>
    %54 = vector.shape_cast %53 : vector<1x8xf32> to vector<1x8x1xf32>
    %55 = vector.broadcast %54 : vector<1x8x1xf32> to vector<1x8x8xf32>
    %56 = arith.subf %52, %55 : vector<1x8x8xf32>
    %57 = math.exp %56 : vector<1x8x8xf32>
    %cst_15 = arith.constant dense<0.000000e+00> : vector<1x8xf32>
    %58 = vector.multi_reduction <add>, %57, %cst_15 [2] : vector<1x8x8xf32> to vector<1x8xf32>
    %59 = vector.shape_cast %58 : vector<1x8xf32> to vector<1x8x1xf32>
    %60 = tpu.reciprocal %59 {approx = true} : vector<1x8x1xf32> -> vector<1x8x1xf32>
    %61 = vector.broadcast %60 : vector<1x8x1xf32> to vector<1x8x8xf32>
    %62 = arith.mulf %57, %61 : vector<1x8x8xf32>
    %63 = arith.truncf %62 : vector<1x8x8xf32> to vector<1x8x8xbf16>
    %cst_16 = arith.constant dense<0.000000e+00> : vector<1x8x8xf32>
    %64 = tpu.matmul %63, %51, %cst_16 {dimension_numbers = #tpu.dot_dimension_numbers<[2], [1], [1], [2], [0, 0, 0, 1, 1, 2], [0], [0]>} : vector<1x8x8xbf16>, vector<1x8x8xbf16>, vector<1x8x8xf32> -> vector<1x8x8xf32>
    %65 = vector.extract_strided_slice %12 {offsets = [0, 0, 24], sizes = [1, 8, 8], strides = [1, 1, 1]} : vector<1x8x32xbf16> to vector<1x8x8xbf16>
    %66 = vector.extract_strided_slice %14 {offsets = [0, 0, 24], sizes = [1, 8, 8], strides = [1, 1, 1]} : vector<1x8x32xbf16> to vector<1x8x8xbf16>
    %67 = vector.extract_strided_slice %16 {offsets = [0, 0, 24], sizes = [1, 8, 8], strides = [1, 1, 1]} : vector<1x8x32xbf16> to vector<1x8x8xbf16>
    %cst_17 = arith.constant dense<0.000000e+00> : vector<1x8x8xf32>
    %68 = tpu.matmul %65, %66, %cst_17 {dimension_numbers = #tpu.dot_dimension_numbers<[2], [2], [1], [1], [0, 0, 0, 1, 1, 1], [0], [0]>} : vector<1x8x8xbf16>, vector<1x8x8xbf16>, vector<1x8x8xf32> -> vector<1x8x8xf32>
    %cst_18 = arith.constant dense<0xFF800000> : vector<1x8xf32>
    %69 = vector.multi_reduction <maximumf>, %68, %cst_18 [2] : vector<1x8x8xf32> to vector<1x8xf32>
    %70 = vector.shape_cast %69 : vector<1x8xf32> to vector<1x8x1xf32>
    %71 = vector.broadcast %70 : vector<1x8x1xf32> to vector<1x8x8xf32>
    %72 = arith.subf %68, %71 : vector<1x8x8xf32>
    %73 = math.exp %72 : vector<1x8x8xf32>
    %cst_19 = arith.constant dense<0.000000e+00> : vector<1x8xf32>
    %74 = vector.multi_reduction <add>, %73, %cst_19 [2] : vector<1x8x8xf32> to vector<1x8xf32>
    %75 = vector.shape_cast %74 : vector<1x8xf32> to vector<1x8x1xf32>
    %76 = tpu.reciprocal %75 {approx = true} : vector<1x8x1xf32> -> vector<1x8x1xf32>
    %77 = vector.broadcast %76 : vector<1x8x1xf32> to vector<1x8x8xf32>
    %78 = arith.mulf %73, %77 : vector<1x8x8xf32>
    %79 = arith.truncf %78 : vector<1x8x8xf32> to vector<1x8x8xbf16>
    %cst_20 = arith.constant dense<0.000000e+00> : vector<1x8x8xf32>
    %80 = tpu.matmul %79, %67, %cst_20 {dimension_numbers = #tpu.dot_dimension_numbers<[2], [1], [1], [2], [0, 0, 0, 1, 1, 2], [0], [0]>} : vector<1x8x8xbf16>, vector<1x8x8xbf16>, vector<1x8x8xf32> -> vector<1x8x8xf32>
    %81 = tpu.concatenate %32, %48, %64, %80 in 2 : vector<1x8x8xf32>, vector<1x8x8xf32>, vector<1x8x8xf32>, vector<1x8x8xf32> -> vector<1x8x32xf32>
    %82 = vector.shape_cast %81 : vector<1x8x32xf32> to vector<8x32xf32>
    %83 = arith.truncf %82 : vector<8x32xf32> to vector<8x32xbf16>
    %c0_21 = arith.constant 0 : index
    %c0_22 = arith.constant 0 : index
    %84 = vector.load %arg3[%c0_21, %c0_22] : memref<32x32xbf16, #tpu.memory_space<vmem>>, vector<32x32xbf16>
    %cst_23 = arith.constant dense<0.000000e+00> : vector<8x32xf32>
    %85 = tpu.matmul %83, %84, %cst_23 {dimension_numbers = #tpu.dot_dimension_numbers<[1], [0], [0], [1], [0, 0, 1, 1], [], []>} : vector<8x32xbf16>, vector<32x32xbf16>, vector<8x32xf32> -> vector<8x32xf32>
    %c0_24 = arith.constant 0 : index
    %c0_25 = arith.constant 0 : index
    %86 = vector.load %arg5[%c0_24, %c0_25] : memref<1x32xf32, #tpu.memory_space<vmem>>, vector<1x32xf32>
    %87 = vector.shape_cast %86 : vector<1x32xf32> to vector<32xf32>
    %88 = vector.shape_cast %87 : vector<32xf32> to vector<1x32xf32>
    %89 = vector.broadcast %88 : vector<1x32xf32> to vector<8x32xf32>
    %90 = arith.addf %85, %89 : vector<8x32xf32>
    %c0_26 = arith.constant 0 : index
    %c0_27 = arith.constant 0 : index
    %91 = vector.load %arg6[%c0_26, %c0_27] : memref<8x32xf32, #tpu.memory_space<vmem>>, vector<8x32xf32>
    tpu.vector_store %arg6[%c0_26, %c0_27], %90 {strides = array<i32>} : memref<8x32xf32, #tpu.memory_space<vmem>>, vector<8x32xf32>,
    return
  }
  func.func @transform_0(%arg0: i32) -> (i32, i32) {
    %c0_i32 = arith.constant 0 : i32
    %c0_i32_0 = arith.constant 0 : i32
    return %arg0, %c0_i32 : i32, i32
  }
  func.func @transform_1(%arg0: i32) -> (i32, i32) {
    %c0_i32 = arith.constant 0 : i32
    %c0_i32_0 = arith.constant 0 : i32
    %c0_i32_1 = arith.constant 0 : i32
    return %c0_i32, %c0_i32_0 : i32, i32
  }
  func.func @transform_2(%arg0: i32) -> (i32, i32) {
    %c0_i32 = arith.constant 0 : i32
    %c0_i32_0 = arith.constant 0 : i32
    %c0_i32_1 = arith.constant 0 : i32
    return %c0_i32, %c0_i32_0 : i32, i32
  }
  func.func @transform_3(%arg0: i32) -> (i32, i32) {
    %c0_i32 = arith.constant 0 : i32
    %c0_i32_0 = arith.constant 0 : i32
    %c0_i32_1 = arith.constant 0 : i32
    return %c0_i32, %c0_i32_0 : i32, i32
  }
  func.func @transform_4(%arg0: i32) -> (i32, i32) {
    %c0_i32 = arith.constant 0 : i32
    %c0_i32_0 = arith.constant 0 : i32
    %c0_i32_1 = arith.constant 0 : i32
    return %c0_i32, %c0_i32_0 : i32, i32
  }
  func.func @transform_5(%arg0: i32) -> (i32, i32) {
    %c0_i32 = arith.constant 0 : i32
    %c0_i32_0 = arith.constant 0 : i32
    return %arg0, %c0_i32 : i32, i32
  }
}

</mosaic_0001>

<bundles_post_ra>
// kernel: tpu_custom_call.1
= control target key start
LH: loop header
LB: loop body
LE: loop exit
PB: predicated region body
PF: predicated region fallthrough
CT: control target
= control target key end

     0   :  { %10 = vsyncpa [#allocation3], 0  ;;  %s1711_s0 = inlined_call_operand.hbm [shape: bf16[16,32], index: 0, kind: input, shape index: {}]   ;;  %s1712_s1 = inlined_call_operand.hbm [shape: bf16[32,96], index: 1, kind: input, shape index: {}]   ;;  %s1713_s2 = inlined_call_operand.hbm [shape: bf16[32,32], index: 2, kind: input, shape index: {}]   ;;  %s1714_s3 = inlined_call_operand.vmem [shape: f32[1,96], index: 3, kind: input, shape index: {}]   ;;  %s1715_s4 = inlined_call_operand.vmem [shape: f32[1,32], index: 4, kind: input, shape index: {}]   ;;  %s1716_s5 = inlined_call_operand.hbm [shape: f32[16,32], index: 5, kind: output, shape index: {}]  }
   0x1   :  { %12 = vsyncpa [#allocation3 + $0x1], 0 }
   0x2   :  { %13 = vsyncpa [#allocation6], 0 }
   0x3   :  { %14 = vsyncpa [#allocation4], 0 }
   0x4   :  { %16 = vsyncpa [#allocation4 + $0x1], 0  ;;  %s1401_s18 = smov 0   ;;  %s1403_s19 = smov 0  }
   0x5   :  { %s1405_s20 = smov 0   ;;  %s1407_s21 = smov 0  }
   0x6 LB: > { %s1422_s22 = sadd.s32 4294967295, %s1347_s21   ;;  %s968_s23 = sadd.s32 4294967294, %s1347_s21   ;;  %s1347_s21 = sphi %s1407_s21, %s1736_s21   ;;  %s1343_s20 = sphi %s1405_s20, %s1735_s20   ;;  %s1339_s19 = sphi %s1403_s19, %s1734_s19   ;;  %s1335_s18 = sphi %s1401_s18, %s1733_s18  }
   0x7   : > { %p42_p0 = scmp.ne.s32.totalorder %s1339_s19, %s1335_s18  ;;  %p1717_p1 = scmp.eq.s32.totalorder %s1422_s22, 0 }
   0x8   : > { %p156_p3 = scmp.eq.s32.totalorder %s968_s23, 1  ;;  %p969_p5 = scmp.ge.s32.totalorder %s1347_s21, 1 }
   0x9   : > { %p1431_p4 = por %p1717_p1, %p42_p0  ;;  %p163_p7 = scmp.lt.s32.totalorder %s1347_s21, 3 }
   0xa   : > { %p1436_p6 = por %p156_p3, %p42_p0  ;;  %s1349_s27 = smov [#allocation5]  }
   0xb   : > { %s1720_s24 = scalar_select %p1431_p4, 1, 0 }
   0xc   : > { %s1721_s25 = scalar_select %p1436_p6, 1, 0 }
   0xd   : > { %p1441_p8 = pnand %p969_p5, %p163_p7  ;;  %s175_s28 = sshll.u32 %s1349_s27, 4  ;;  %s1445_s28 = int_to_ptr.vmem [resolvable:$true] %s175_s28 }
   0xe   : > { %s1350_s30 = smov [#allocation7]   ;;  %s1191_s9 = scalar_lea.hbm %s1712_s1, 256 }
   0xf   : > { %p1098_p9 = pneg %p1441_p8  ;;  %s188_s6 = sshll.u32 %s1350_s30, 4  ;;  %s1456_s6 = int_to_ptr.vmem [resolvable:$true] %s188_s6 }
  0x10   : > { %p1192_p12 = scmp.ne.s32.totalorder %s1712_s1, %s1191_s9  ;;  %p1198_p5 = scmp.lt.u32.totalorder %s1191_s9, %s1712_s1 }
  0x11   : > { %p1452_p11 = pnand %p1098_p9, %p1717_p1 }
  0x13   : > { %p1193_p13 = pneg %p1452_p11 }
  0x15   : > { %p1194_p0 = pnand %p1193_p13, %p1192_p12 }
  0x17   : > { %p1195_p3 = pneg %p1194_p0 }
  0x19   : > { %p1200_p7 = pnand %p1198_p5, %p1195_p3 }
  0x1b   : > { %1203 = shalt.err (!%p1200_p7)
}
  0x1c   : > { %s1204_s14 = scalar_lea.vmem %s1445_s28, 256  ;;  %p1212_p2 = scmp.lt.s32.totalorder %s1445_s28, %s1445_s28 }
  0x1d   : > { %p1205_p9 = scmp.ne.s32.totalorder %s1445_s28, %s1204_s14  ;;  %p1213_p12 = scmp.lt.s32.totalorder %s1204_s14, %s1204_s14 }
  0x1f   : > { %p1207_p10 = pnand %p1205_p9, %p1193_p13  ;;  %p1214_p0 = por %p1213_p12, %p1212_p2 }
  0x21   : > { %p1208_p1 = pneg %p1207_p10 }
  0x23   : > { %p1215_p6 = pnand %p1214_p0, %p1208_p1 }
  0x25   : > { %1218 = shalt.err (!%p1215_p6)
}
  0x26   : > { %s1351_s15 = smov 64   ;;  %s1352_s16 = smov 4  }
  0x27   : > { %1101 = dma.hbm_to_vmem [thread:$0]  (!%p1452_p11), %s1712_s1, 256, %s1445_s28, [#allocation6], %s1351_s15, %s1351_s15, %s1352_s16  }
  0x28   : > { %s1219_s7 = scalar_lea.hbm %s1713_s2, 256 }
  0x29   : > { %p1220_p2 = scmp.ne.s32.totalorder %s1713_s2, %s1219_s7  ;;  %p1226_p10 = scmp.lt.u32.totalorder %s1219_s7, %s1713_s2 }
  0x2b   : > { %p1222_p1 = pnand %p1220_p2, %p1193_p13 }
  0x2d   : > { %p1223_p6 = pneg %p1222_p1 }
  0x2f   : > { %p1228_p3 = pnand %p1226_p10, %p1223_p6 }
  0x31   : > { %1231 = shalt.err (!%p1228_p3)
}
  0x32   : > { %s1232_s28 = scalar_lea.vmem %s1456_s6, 256  ;;  %p1240_p12 = scmp.lt.s32.totalorder %s1456_s6, %s1456_s6 }
  0x33   : > { %p1233_p5 = scmp.ne.s32.totalorder %s1456_s6, %s1232_s28  ;;  %p1241_p0 = scmp.lt.s32.totalorder %s1232_s28, %s1232_s28 }
  0x35   : > { %p1235_p7 = pnand %p1233_p5, %p1193_p13  ;;  %p1242_p2 = por %p1241_p0, %p1240_p12 }
  0x37   : > { %p1236_p9 = pneg %p1235_p7 }
  0x39   : > { %p1243_p1 = pnand %p1242_p2, %p1236_p9 }
  0x3b   : > { %1246 = shalt.err (!%p1243_p1)
}
  0x3c   : > { %1104 = dma.hbm_to_vmem [thread:$0]  (!%p1452_p11), %s1713_s2, 256, %s1456_s6, [#allocation6], %s1351_s15, %s1351_s15, %s1352_s16  }
  0x3d   : > { %s1511_s14 = sadd.s32 1, %s1347_s21   ;;  %s29_s29 = sadd.s32 1, %s1343_s20 }
  0x3e   : > { %s26_s17 = ssub.s32 %s1347_s21, %s1511_s14  ;;  %p36_p13 = scmp.ne.s32.totalorder %s1343_s20, %s1339_s19 }
  0x3f   : > { %p27_p6 = scmp.eq.s32.totalorder %s26_s17, 0  ;;  %p37_p10 = scmp.eq.s32.totalorder %s1347_s21, 0 }
  0x40   : > { %p1724_p3 = scmp.eq.s32.totalorder %s1422_s22, 1  ;;  %p1115_p7 = scmp.lt.s32.totalorder %s1347_s21, 2 }
  0x41   : > { %s1527_s27 = scalar_select %p27_p6, %s1343_s20, %s29_s29  }
  0x42   : > { %p1521_p5 = por %p1724_p3, %p36_p13  ;;  %p38_p9 = por %p37_p10, %p36_p13 }
  0x43   : > { %s208_s30 = sand.u32 1, %s1343_s20   ;;  %s974_s6 = sshll.u32 %s1347_s21, 6 }
  0x44   : > { %s1725_s23 = scalar_select %p1521_p5, 1, 0 }
  0x45   : > { %s973_s7 = sshll.u32 %s208_s30, 2  ;;  %s1534_s8 = scalar_lea.hbm %s1711_s0, %s974_s6 }
  0x46   : > { %s212_s9 = scalar_lea.vmem [#allocation2], %s973_s7  ;;  %p1538_p11 = pnand %p1115_p7, %p38_p9 }
  0x47   : > { %s219_s10 = sshll.u32 %s212_s9, 4  ;;  %s209_s28 = scalar_lea.sflag [#allocation3], %s208_s30  ;;  %s1536_s10 = int_to_ptr.vmem [resolvable:$true] %s219_s10 }
  0x48   : > { %s1247_s12 = scalar_lea.hbm %s1534_s8, 64  ;;  %p1249_p0 = pneg %p1538_p11 }
  0x49   : > { %p1248_p12 = scmp.ne.s32.totalorder %s1534_s8, %s1247_s12  ;;  %s1252_s17 = scalar_lea.hbm %s1711_s0, 128 }
  0x4a   : > { %p1253_p13 = scmp.lt.u32.totalorder %s1534_s8, %s1711_s0  ;;  %p1254_p6 = scmp.lt.u32.totalorder %s1252_s17, %s1247_s12 }
  0x4b   : > { %p1250_p2 = pnand %p1249_p0, %p1248_p12  ;;  %p1256_p3 = scmp.lt.u32.totalorder %s1247_s12, %s1534_s8 }
  0x4c   : > { %p1255_p10 = por %p1254_p6, %p1253_p13 }
  0x4d   : > { %p1251_p1 = pneg %p1250_p2 }
  0x4e   : > { %p1257_p7 = por %p1256_p3, %p1255_p10 }
  0x50   : > { %p1258_p9 = pnand %p1257_p7, %p1251_p1 }
  0x52   : > { %1261 = shalt.err (!%p1258_p9)
}
  0x53   : > { %s1262_s30 = scalar_lea.vmem %s1536_s10, 64  ;;  %s1353_s15 = smov [#allocation2]  }
  0x54   : > { %p1263_p12 = scmp.ne.s32.totalorder %s1536_s10, %s1262_s30  ;;  %s1267_s16 = sshll.u32 %s1353_s15, 4  ;;  %s1268_s16 = int_to_ptr.vmem [resolvable:$false] %s1267_s16 }
  0x55   : > { %s1269_s9 = scalar_lea.vmem %s1268_s16, 128  ;;  %p1270_p4 = scmp.lt.s32.totalorder %s1536_s10, %s1268_s16 }
  0x56   : > { %p1265_p2 = pnand %p1263_p12, %p1249_p0  ;;  %p1271_p13 = scmp.lt.s32.totalorder %s1269_s9, %s1262_s30 }
  0x58   : > { %p1266_p5 = pneg %p1265_p2  ;;  %p1272_p6 = por %p1271_p13, %p1270_p4 }
  0x5a   : > { %p1273_p10 = pnand %p1272_p6, %p1266_p5 }
  0x5c   : > { %1276 = shalt.err (!%p1273_p10)
}
  0x5d   : > { %1108 = dma.hbm_to_vmem [thread:$0]  (!%p1538_p11), %s1534_s8, 64, %s1536_s10, %s209_s28  }
  0x5e   : > { %228 = sbr.rel (%p1441_p8) target bundleno = 1602 (0x642), region = 40  ;;  %s1570_s12 = sand.u32 (!%p1441_p8), 1, %s1339_s19  }
  0x5f   : > { %s976_s13 = sshll.u32 (!%p1441_p8), %s1570_s12, 2  ;;  %s231_s29 = scalar_lea.sflag (!%p1441_p8), [#allocation3], %s1570_s12 }
  0x60   : > { %s234_s17 = scalar_lea.vmem (!%p1441_p8), [#allocation2], %s976_s13  ;;  %p1727_p4 = scmp.ne.s32.totalorder (!%p1441_p8), %s1720_s24, 0 }
  0x65   : > { %1322 = dma.done.wait (%p1727_p4), %s231_s29, 64  }
  0x66   : > { %1324 = vsyncadd (%p1727_p4), %s231_s29, 4294967232  ;;  %p1728_p5 = scmp.eq.s32.totalorder %s1422_s22, 0 }
  0x68   : > { %1326 = dma.done.wait (%p1728_p5), [#allocation6], 512   ;;  %p1729_p11 = pmov %p1728_p5 }
  0x69   : > { %v1354_v0 = vmov 0.0   ;;  %vm1355_vm0 = vmmov 0   ;;  %v1171_v1 = vld [vmem:[#allocation5] sm:$0xff]   ;;  %v1172_v2 = vld [vmem:[#allocation5 + $0x8] sm:$0xff]   ;;  %v270_v3 = vld [vmem:[%s234_s17] sm:$0xf] }
  0x6a   : > { %1328 = vsyncadd (%p1729_p11), [#allocation6], 4294966784  ;;  %1022 = vmatprep.subr.bf16.mxu0 %v1354_v0  ;;  %1026 = vmatprep.mubr.msk.bf16.mxu0 %vm1355_vm0, %v1354_v0  ;;  %vm294_vm1 = vcmask 261120   ;;  %v980_v4 = vld [vmem:[%s1714_s3] ss:$0 sm:$0xff]  ;;  %s1356_s8 = smov 120  }
  0x6b   : > { %1030 = vmatprep.subr.bf16.mxu1 %v1354_v0  ;;  %1032 = vmatprep.mubr.msk.bf16.mxu1 %vm1355_vm0, %v1354_v0  ;;  %s1357_s10 = smov 96   ;;  %s1358_s11 = smov 80   ;;  %vm342_vm2 = vcmask 64512   ;;  %vm406_vm3 = vcmask 1043456   ;;  %vm793_vm4 = vcmask 130048   ;;  %vm795_vm5 = vcmask 195584  }
  0x6c   : > { %1023 = vmatpush3.bf16.msra.mxu0 %v1171_v1  ;;  %s1359_s28 = smov 88   ;;  %s1360_s7 = smov 72  }
  0x6d   : > { %1024 = vmatprep.subr.bf16.mxu0 %v1354_v0  ;;  %s1361_s6 = smov 112   ;;  %s1362_s30 = smov 104  }
  0x6e   : > { %s1363_s15 = smov 56   ;;  %s1364_s16 = smov 64  }
  0x6f   : > { %s1365_s9 = smov 40   ;;  %s1366_s13 = smov 48  }
  0x70   : > { %1025 = vmatpush3.bf16.msra.mxu0 %v1172_v2  ;;  %s1367_s29 = smov 8   ;;  %s1368_s17 = smov 16  }
  0x71   : > { %1036 = vmatprep.subr.bf16.mxu0 %v1354_v0  ;;  %s1369_s24 = smov 24   ;;  %s979_s26 = sshll.u32 %s1570_s12, 3 }
  0x72   : > { %p1730_p0 = scmp.ne.s32.totalorder %s1725_s23, 0 }
  0x73   : > { %1027 = vmatmul.mubr.msk.bf16.vlgmr.msra.gmra.mrb[0].mxu0 %vm294_vm1, %v270_v3 }
  0x74   : > { %1038 = vmatprep.mubr.msk.bf16.mxu0 %vm1355_vm0, %v1354_v0 }
 0x146   : > { %v332_v5 = vpop.f32.mrb[0].mxu0 }
 0x147   : > { %v333_v6 = vadd.f32 %v980_v4, %v332_v5  ;;  %v1028_v7 = vpop.f32.mrb[1].mxu0 }
 0x148   : > { %v335_v8 = vpop.f32.mrb[2].mxu0 }
 0x149   : > { %v1596_v9 = vpack.c.bf16 %v333_v6, %v333_v6  ;;  %v1029_v10 = vpop.f32.mrb[3].mxu0 }
 0x14b   : > { %450 = vrot.lane.b32.xlu1 %v1596_v9, %s1356_s8  ;;  %340 = vrot.lane.b32.xlu0 %v1596_v9, %s1357_s10 }
 0x14f   : > { %562 = vrot.lane.b32.xlu1 %v1596_v9, %s1358_s11  ;;  %452 = vrot.lane.b32.xlu0 %v1596_v9, %s1359_s28  ;;  %s997_s11 = sshll.u32 %s1422_s22, 7  ;;  %s268_s28 = scalar_lea.vmem [#allocation8], %s979_s26 }
 0x150   : > { %s866_s22 = scalar_lea.sflag [#allocation4], %s1570_s12 }
 0x153   : > { %672 = vrot.lane.b32.xlu1 %v1596_v9, %s1360_s7  ;;  %560 = vrot.lane.b32.xlu0 %v1596_v9, %s1361_s6  ;;  %s879_s7 = sshll.u32 %s268_s28, 4  ;;  %s1668_s7 = int_to_ptr.vmem [resolvable:$true] %s879_s7 }
 0x157   : > { %670 = vrot.lane.b32.xlu0 %v1596_v9, %s1362_s30 }
 0x1bd   : > { %v341_v11 = vpop.permute.xlu0 %340  ;;  %v451_v14 = vpop.permute.xlu1 %450 }
 0x1be   : > { %v347_v12 = vsel %vm342_vm2, %v341_v11, 0 }
 0x1bf   : > { %1031 = vmatpush3.bf16.xpose.msra.mxu1 %v347_v12 }
 0x1c0   : > { %1042 = vmatprep.subr.bf16.mxu1 %v1354_v0 }
 0x1c1   : > { %v453_v13 = vpop.permute.xlu0 %452  ;;  %v563_v16 = vpop.permute.xlu1 %562 }
 0x1c2   : > { %v458_v15 = vsel %vm342_vm2, %v453_v13, 0  ;;  %v568_v17 = vsel %vm342_vm2, %v563_v16, 0 }
 0x1c5   : > { %v673_v18 = vpop.permute.xlu1 %672  ;;  %v561_v19 = vpop.permute.xlu0 %560 }
 0x1c6   : > { %1033 = vmatmul.mubr.msk.bf16.vlgmr.msra.gmra.mrb[0].mxu1 %vm342_vm2, %v1596_v9  ;;  %v678_v20 = vsel %vm342_vm2, %v673_v18, 0 }
 0x1c7   : > { %1043 = vmatpush3.bf16.xpose.msra.mxu1 %v458_v15  ;;  %1044 = vmatprep.mubr.msk.bf16.mxu1 %vm1355_vm0, %v1354_v0 }
 0x1c8   : > { %1054 = vmatprep.subr.bf16.mxu1 %v1354_v0 }
 0x1c9   : > { %v671_v21 = vpop.permute.xlu0 %670 }
 0x1ce   : > { %1045 = vmatmul.mubr.msk.bf16.vlgmr.msra.gmra.mrb[4].mxu1 %vm342_vm2, %v451_v14 }
 0x1cf   : > { %1055 = vmatpush3.bf16.xpose.msra.mxu1 %v568_v17  ;;  %1056 = vmatprep.mubr.msk.bf16.mxu1 %vm1355_vm0, %v1354_v0 }
 0x1d0   : > { %1066 = vmatprep.subr.bf16.mxu1 %v1354_v0 }
 0x1d6   : > { %1057 = vmatmul.mubr.msk.bf16.vlgmr.msra.gmra.mrb[8].mxu1 %vm342_vm2, %v561_v19 }
 0x1d7   : > { %1067 = vmatpush3.bf16.xpose.msra.mxu1 %v678_v20  ;;  %1068 = vmatprep.mubr.msk.bf16.mxu1 %vm1355_vm0, %v1354_v0 }
 0x1d8   : > { %1078 = vmatprep.subr.bf16.mxu1 %v1354_v0 }
 0x1de   : > { %1069 = vmatmul.mubr.msk.bf16.vlgmr.msra.gmra.mrb[12].mxu1 %vm342_vm2, %v671_v21 }
 0x1df   : > { %1082 = vmatprep.mubr.msk.bf16.mxu1 %vm1355_vm0, %v1354_v0 }
 0x299   : > { %v383_v22 = vpop.f32.mrb[0].mxu1 }
 0x29a   : > { %v1034_v23 = vpop.f32.mrb[1].mxu1  ;;  %v389_v24 = vsel %vm342_vm2, %v383_v22, -inf }
 0x29b   : > { %390 = vmax.xlane.f32.xlu1 %v389_v24  ;;  %v386_v25 = vpop.f32.mrb[2].mxu1 }
 0x29c   : > { %v1035_v26 = vpop.f32.mrb[3].mxu1 }
 0x2a1   : > { %v494_v27 = vpop.f32.mrb[4].mxu1 }
 0x2a2   : > { %v1046_v28 = vpop.f32.mrb[5].mxu1  ;;  %v500_v29 = vsel %vm342_vm2, %v494_v27, -inf }
 0x2a3   : > { %501 = vmax.xlane.f32.xlu0 %v500_v29  ;;  %v497_v30 = vpop.f32.mrb[6].mxu1 }
 0x2a4   : > { %v1047_v31 = vpop.f32.mrb[7].mxu1 }
 0x2a5   : > { %v1173_v31 = vld [vmem:[#allocation7] sm:$0xff]  }
 0x2a6   : > { %1079 = vmatpush3.bf16.msra.mxu1 %v1173_v31 }
 0x2a7   : > { %1080 = vmatprep.subr.bf16.mxu1 %v1354_v0 }
 0x2a9   : > { %v604_v32 = vpop.f32.mrb[8].mxu1 }
 0x2aa   : > { %v1058_v33 = vpop.f32.mrb[9].mxu1  ;;  %v610_v34 = vsel %vm342_vm2, %v604_v32, -inf }
 0x2ab   : > { %611 = vmax.xlane.f32.xlu0 %v610_v34  ;;  %v607_v35 = vpop.f32.mrb[10].mxu1 }
 0x2ac   : > { %v1059_v36 = vpop.f32.mrb[11].mxu1 }
 0x2b1   : > { %v714_v37 = vpop.f32.mrb[12].mxu1 }
 0x2b2   : > { %v1070_v38 = vpop.f32.mrb[13].mxu1  ;;  %v720_v39 = vsel %vm342_vm2, %v714_v37, -inf }
 0x2b3   : > { %721 = vmax.xlane.f32.xlu1 %v720_v39  ;;  %v717_v40 = vpop.f32.mrb[14].mxu1 }
 0x2b4   : > { %v1071_v41 = vpop.f32.mrb[15].mxu1 }
 0x328   : > { %v391_v42 = vpop.xlane.xlu1 %390 }
 0x329   : > { %v392_v43 = vsub.f32 %v383_v22, %v391_v42 }
 0x32b   : > { %v393_v44 = vmul.f32 1.442695, %v392_v43 }
 0x32d   : > { %1175 = vpow2.f32 %v393_v44 }
 0x330   : > { %v502_v45 = vpop.xlane.xlu0 %501 }
 0x331   : > { %v503_v46 = vsub.f32 %v494_v27, %v502_v45 }
 0x333   : > { %v504_v47 = vmul.f32 1.442695, %v503_v46 }
 0x335   : > { %1177 = vpow2.f32 %v504_v47  ;;  %v992_v47 = vld [vmem:[%s1715_s4] ss:$0 sm:$0xff] }
 0x337   : > { %v1176_v48 = vpop.eup %1175 }
 0x338   : > { %v612_v49 = vpop.xlane.xlu0 %611  ;;  %v395_v50 = vsel %vm342_vm2, %v1176_v48, 0.0 }
 0x339   : > { %v613_v51 = vsub.f32 %v604_v32, %v612_v49  ;;  %396 = vadd.xlane.f32.xlu0 %v395_v50  ;;  %v1174_v32 = vld [vmem:[#allocation7 + $0x8] sm:$0xff]  }
 0x33a   : > { %1081 = vmatpush3.bf16.msra.mxu1 %v1174_v32 }
 0x33b   : > { %v614_v52 = vmul.f32 1.442695, %v613_v51 }
 0x33d   : > { %1179 = vpow2.f32 %v614_v52 }
 0x33f   : > { %v1178_v53 = vpop.eup %1177 }
 0x340   : > { %v506_v54 = vsel %vm342_vm2, %v1178_v53, 0.0  ;;  %v722_v57 = vpop.xlane.xlu1 %721 }
 0x341   : > { %507 = vadd.xlane.f32.xlu1 %v506_v54  ;;  %v723_v58 = vsub.f32 %v714_v37, %v722_v57 }
 0x343   : > { %v724_v59 = vmul.f32 1.442695, %v723_v58 }
 0x345   : > { %1181 = vpow2.f32 %v724_v59 }
 0x347   : > { %v1180_v55 = vpop.eup %1179 }
 0x348   : > { %v616_v56 = vsel %vm342_vm2, %v1180_v55, 0.0 }
 0x349   : > { %617 = vadd.xlane.f32.xlu0 %v616_v56 }
 0x34f   : > { %v1182_v60 = vpop.eup %1181 }
 0x350   : > { %v726_v61 = vsel %vm342_vm2, %v1182_v60, 0.0 }
 0x352   : > { %512 = vrot.lane.b32.xlu1 %v1596_v9, %s1363_s15  ;;  %s1666_s15 = scalar_lea.hbm %s1716_s5, %s997_s11 }
 0x35f   : > { %401 = vrot.lane.b32.xlu0 %v1596_v9, %s1364_s16  ;;  %s1277_s16 = scalar_lea.vmem %s1668_s7, 128 }
 0x360   : > { %p1278_p8 = scmp.ne.s32.totalorder %s1668_s7, %s1277_s16 }
 0x362   : > { %p1279_p1 = pnand %p1278_p8, %p1730_p0 }
 0x363   : > { %732 = vrot.lane.b32.xlu0 %v1596_v9, %s1365_s9  ;;  %s1370_s9 = smov [#allocation8]  }
 0x364   : > { %p1280_p3 = pneg %p1279_p1 }
 0x376   : > { %727 = vadd.xlane.f32.xlu1 %v726_v61 }
 0x387   : > { %622 = vrot.lane.b32.xlu1 %v1596_v9, %s1366_s13  ;;  %s1281_s13 = sshll.u32 %s1370_s9, 4  ;;  %s1282_s13 = int_to_ptr.vmem [resolvable:$false] %s1281_s13 }
 0x388   : > { %p1284_p7 = scmp.lt.s32.totalorder %s1668_s7, %s1282_s13 }
 0x3c6   : > { %v397_v62 = vpop.xlane.xlu0 %396 }
 0x3c7   : > { %1183 = vrcp.f32 %v397_v62 }
 0x3ce   : > { %v508_v63 = vpop.xlane.xlu1 %507 }
 0x3cf   : > { %1185 = vrcp.f32 %v508_v63 }
 0x3d1   : > { %v1184_v1 = vpop.eup %1183 }
 0x3d2   : > { %v399_v3 = vmul.f32 %v1184_v1, %v1176_v48  ;;  %v513_v6 = vpop.permute.xlu1 %512 }
 0x3d3   : > { %v518_v10 = vsel %vm406_vm3, %v513_v6, 0 }
 0x3d4   : > { %v400_v7 = vpack.c.bf16 %v399_v3, %v399_v3 }
 0x3d6   : > { %v618_v2 = vpop.xlane.xlu0 %617 }
 0x3d7   : > { %1187 = vrcp.f32 %v618_v2 }
 0x3d9   : > { %v1186_v8 = vpop.eup %1185 }
 0x3da   : > { %v402_v4 = vpop.permute.xlu0 %401  ;;  %v510_v9 = vmul.f32 %v1186_v8, %v1178_v53 }
 0x3db   : > { %v408_v5 = vsel %vm406_vm3, %v402_v4, 0 }
 0x3dc   : > { %1037 = vmatpush3.bf16.msra.mxu0 %v408_v5  ;;  %v511_v11 = vpack.c.bf16 %v510_v9, %v510_v9 }
 0x3dd   : > { %1048 = vmatprep.subr.bf16.mxu0 %v1354_v0 }
 0x3de   : > { %v733_v17 = vpop.permute.xlu0 %732 }
 0x3df   : > { %1039 = vmatmul.mubr.msk.bf16.vlgmr.msra.gmra.mrb[4].mxu0 %vm342_vm2, %v400_v7  ;;  %v738_v19 = vsel %vm406_vm3, %v733_v17, 0 }
 0x3e0   : > { %1049 = vmatpush3.bf16.msra.mxu0 %v518_v10  ;;  %1050 = vmatprep.mubr.msk.bf16.mxu0 %vm1355_vm0, %v1354_v0 }
 0x3e1   : > { %1060 = vmatprep.subr.bf16.mxu0 %v1354_v0  ;;  %v1188_v12 = vpop.eup %1187 }
 0x3e2   : > { %v620_v14 = vmul.f32 %v1188_v12, %v1180_v55 }
 0x3e4   : > { %v621_v18 = vpack.c.bf16 %v620_v14, %v620_v14 }
 0x3e7   : > { %1051 = vmatmul.mubr.msk.bf16.vlgmr.msra.gmra.mrb[8].mxu0 %vm342_vm2, %v511_v11 }
 0x3e8   : > { %1062 = vmatprep.mubr.msk.bf16.mxu0 %vm1355_vm0, %v1354_v0 }
 0x403   : > { %v728_v13 = vpop.xlane.xlu1 %727 }
 0x404   : > { %1189 = vrcp.f32 %v728_v13 }
 0x407   : > { %v623_v15 = vpop.permute.xlu1 %622 }
 0x408   : > { %v628_v16 = vsel %vm406_vm3, %v623_v15, 0 }
 0x409   : > { %1061 = vmatpush3.bf16.msra.mxu0 %v628_v16 }
 0x40a   : > { %1072 = vmatprep.subr.bf16.mxu0 %v1354_v0 }
 0x40c   : > { %1063 = vmatmul.mubr.msk.bf16.vlgmr.msra.gmra.mrb[12].mxu0 %vm342_vm2, %v621_v18 }
 0x40d   : > { %1073 = vmatpush3.bf16.msra.mxu0 %v738_v19  ;;  %1074 = vmatprep.mubr.msk.bf16.mxu0 %vm1355_vm0, %v1354_v0 }
 0x40e   : > { %v1190_v20 = vpop.eup %1189 }
 0x40f   : > { %v730_v21 = vmul.f32 %v1190_v20, %v1182_v60 }
 0x411   : > { %v731_v22 = vpack.c.bf16 %v730_v21, %v730_v21 }
 0x414   : > { %1075 = vmatmul.mubr.msk.bf16.vlgmr.msra.gmra.mrb[16].mxu0 %vm342_vm2, %v731_v22 }
 0x4b2   : > { %v444_v23 = vpop.f32.mrb[4].mxu0 }
 0x4b3   : > { %v1040_v24 = vpop.f32.mrb[5].mxu0 }
 0x4b4   : > { %v447_v25 = vpop.f32.mrb[6].mxu0 }
 0x4b5   : > { %v1041_v26 = vpop.f32.mrb[7].mxu0 }
 0x4ba   : > { %v554_v27 = vpop.f32.mrb[8].mxu0 }
 0x4bb   : > { %781 = vrot.lane.b32.xlu1 %v554_v27, %s1367_s29  ;;  %v1052_v28 = vpop.f32.mrb[9].mxu0  ;;  %s1283_s29 = scalar_lea.vmem %s1282_s13, 256 }
 0x4bc   : > { %v557_v29 = vpop.f32.mrb[10].mxu0  ;;  %p1285_p9 = scmp.lt.s32.totalorder %s1283_s29, %s1277_s16 }
 0x4bd   : > { %v1053_v30 = vpop.f32.mrb[11].mxu0 }
 0x4be   : > { %p1286_p12 = por %p1285_p9, %p1284_p7 }
 0x4c0   : > { %p1287_p2 = pnand %p1286_p12, %p1280_p3 }
 0x4df   : > { %v664_v33 = vpop.f32.mrb[12].mxu0 }
 0x4e0   : > { %785 = vrot.lane.b32.xlu0 %v664_v33, %s1368_s17  ;;  %v1064_v34 = vpop.f32.mrb[13].mxu0 }
 0x4e1   : > { %v667_v35 = vpop.f32.mrb[14].mxu0 }
 0x4e2   : > { %v1065_v36 = vpop.f32.mrb[15].mxu0 }
 0x4e7   : > { %v774_v37 = vpop.f32.mrb[16].mxu0 }
 0x4e8   : > { %789 = vrot.lane.b32.xlu1 %v774_v37, %s1369_s24  ;;  %v1076_v38 = vpop.f32.mrb[17].mxu0 }
 0x4e9   : > { %v777_v39 = vpop.f32.mrb[18].mxu0 }
 0x4ea   : > { %v1077_v40 = vpop.f32.mrb[19].mxu0 }
 0x52d   : > { %v782_v41 = vpop.permute.xlu1 %781 }
 0x52e   : > { %v792_v0 = vsel %vm342_vm2, %v444_v23, %v782_v41 }
 0x552   : > { %v786_v42 = vpop.permute.xlu0 %785 }
 0x553   : > { %v794_v43 = vsel %vm793_vm4, %v792_v0, %v786_v42 }
 0x55a   : > { %v790_v44 = vpop.permute.xlu1 %789 }
 0x55b   : > { %v796_v45 = vsel %vm795_vm5, %v794_v43, %v790_v44 }
 0x55c   : > { %v797_v46 = vpack.c.bf16 %v796_v45, %v796_v45 }
 0x55e   : > { %1083 = vmatmul.mubr.msk.bf16.vlgmr.msra.gmra.mrb[16].mxu1 %vm294_vm1, %v797_v46 }
 0x631   : > { %v858_v48 = vpop.f32.mrb[16].mxu1 }
 0x632   : > { %v859_v49 = vadd.f32 %v992_v47, %v858_v48  ;;  %v1084_v50 = vpop.f32.mrb[17].mxu1 }
 0x633   : > { %v861_v51 = vpop.f32.mrb[18].mxu1 }
 0x634   : > { %v1085_v52 = vpop.f32.mrb[19].mxu1  ;;  %864 = vst.msk [vmem:[%s268_s28] sm:$0xff] %vm294_vm1, %v859_v49 }
 0x635   : > { %1290 = shalt.err (!%p1287_p2)
}
 0x636   : > { %s1291_s12 = scalar_lea.hbm %s1666_s15, 128  ;;  %s1295_s26 = scalar_lea.hbm %s1716_s5, 256 }
 0x637   : > { %p1292_p13 = scmp.ne.s32.totalorder %s1666_s15, %s1291_s12  ;;  %p1296_p4 = scmp.lt.u32.totalorder %s1666_s15, %s1716_s5 }
 0x638   : > { %p1297_p5 = scmp.lt.u32.totalorder %s1295_s26, %s1291_s12  ;;  %p1299_p8 = scmp.lt.u32.totalorder %s1291_s12, %s1666_s15 }
 0x639   : > { %p1293_p6 = pnand %p1292_p13, %p1730_p0 }
 0x63a   : > { %p1298_p11 = por %p1297_p5, %p1296_p4 }
 0x63b   : > { %p1294_p10 = pneg %p1293_p6 }
 0x63c   : > { %p1300_p1 = por %p1299_p8, %p1298_p11 }
 0x63e   : > { %p1301_p3 = pnand %p1300_p1, %p1294_p10 }
 0x640   : > { %1304 = shalt.err (!%p1301_p3)
}
 0x641   : > { %1096 = dma.vmem_to_hbm [thread:$0]  (%p1730_p0), %s1668_s7, 128, %s1666_s15, %s866_s22  }
 0x642 PF: > { %s891_s11 = sand.u32 1, %s1335_s18   ;;  %p1731_p7 = scmp.ne.s32.totalorder %s1721_s25, 0 }
 0x643   : > { %p1732_p9 = scmp.ge.s32.totalorder %s1347_s21, 2  ;;  %s892_s28 = scalar_lea.sflag [#allocation4], %s891_s11 }
 0x645   : > { %p1110_p12 = pnand %p1732_p9, %p1731_p7 }
 0x647   : > { %1330 = dma.done.wait (!%p1110_p12), %s892_s28, 128  }
 0x648   : > { %1332 = vsyncadd (!%p1110_p12), %s892_s28, 4294967168  ;;  %p19_p2 = scmp.ge.s32.totalorder %s1511_s14, 4   ;;  %s1733_s18 = smov %s1339_s19 }
 0x649   : > { %s1734_s19 = smov %s1343_s20  ;;  %s1735_s20 = smov %s1527_s27 }
 0x64a   : > { %s1736_s21 = smov %s1511_s14  ;;  %21 = sbr.rel (!%p19_p2) target bundleno = 6 (0x6), region = 93 }
 0x651   :  { %897 = vsyncpa [#allocation3], 1 }
 0x652   :  { %899 = vsyncpa [#allocation3 + $0x1], 1 }
 0x653   :  { %900 = vsyncpa [#allocation6], 1 }
 0x654   :  { %901 = vsyncpa [#allocation4], 1 }
 0x655   :  { %903 = vsyncpa [#allocation4 + $0x1], 1 }

</bundles_post_ra>
